<compile_context>
chip_gen: v7x
topology: tpu7x:2x2x1
jax: 0.10.0
libtpu: 0.0.40
codegen_flags: <defaults>
</compile_context>

<pallas_src>
import jax
import jax.numpy as jnp
from jax.experimental import pallas as pl
from jax.experimental.pallas import tpu as pltpu


def _critic_kernel(x_ref, p_ref, out_ref):
    # x_ref  : (TB, K=2C) native dtype -- flattened city coordinates for this tile
    # p_ref  : (R, H)     f32 fused-parameter slab (resident across grid steps):
    #            rows 0..K-1 : wf_tiled = tile(We @ W1, (C, 1)) / C      (K, H)
    #            row  K      : bf       = be @ W1 + b1                   (1, H)
    #            row  K+1    : w2^T                                      (1, H)
    #            row  K+2    : [b2, 0, 0, ...]                           (1, H)
    #            rows K+3..  : zero padding to a multiple of 8 sublanes
    # out_ref: (TB, 1) f32
    K = x_ref.shape[1]

    xf = x_ref[...].astype(jnp.float32)                               # in-kernel upcast
    wft = p_ref[0:K, :]                                               # (K, H)
    bf = p_ref[K:K + 1, :]                                            # (1, H)
    w2 = p_ref[K + 1:K + 2, :]                                        # (1, H)
    b2 = p_ref[K + 2:K + 3, 0:1]                                      # (1, 1)

    # mean-over-cities + embedding + FF layer 1, all folded into one MXU matmul.
    h = jnp.dot(xf, wft, preferred_element_type=jnp.float32) + bf     # (TB, H)
    h = jnp.maximum(h, 0.0)

    # Final Linear(128, 1) as VPU multiply + lane reduction.
    v = jnp.sum(h * w2, axis=-1, keepdims=True) + b2                  # (TB, 1)
    out_ref[...] = v.astype(out_ref.dtype)


def fuse_critic_params(params, num_cities):
    """Build the fused (R, H) f32 parameter slab. Call ONCE per weight set."""
    f32 = jnp.float32
    we = jnp.asarray(params["we"], f32)                     # (2, E)
    be = jnp.asarray(params["be"], f32).reshape(1, -1)      # (1, E)
    w1 = jnp.asarray(params["w1"], f32)                     # (E, H)
    b1 = jnp.asarray(params["b1"], f32).reshape(1, -1)      # (1, H)
    w2 = jnp.asarray(params["w2"], f32)                     # (H, 1)
    b2 = jnp.asarray(params["b2"], f32).reshape(-1)[0]      # scalar (handles (1,) / (1,1))
    H = w1.shape[1]
    C = int(num_cities)

    # Exact folds (linearity):
    #   relu(mean_c(x @ We + be) @ W1 + b1)
    #     == relu( x.reshape(B, 2C) @ (tile(We@W1, C)/C) + (be@W1 + b1) )
    wf = we @ w1                                             # (2, H)
    bf = be @ w1 + b1                                        # (1, H)
    wf_tiled = jnp.tile(wf, (C, 1)) / float(C)               # (2C, H); row c*2+f = wf[f]/C
    K = wf_tiled.shape[0]

    b2row = jnp.zeros((1, H), f32).at[0, 0].set(b2)
    R = ((K + 3 + 7) // 8) * 8                               # pad rows to a multiple of 8
    pad = jnp.zeros((R - (K + 3), H), f32)
    return jnp.concatenate([wf_tiled, bf, w2.T, b2row, pad], axis=0)   # (R, H)


def _pick_batch_tile(B, K):
    """Batch tile: large (fewer grid steps / closer to HBM roofline) but VMEM-safe,
    and >= 2 grid steps for non-trivial B so v7x's two TensorCores both work."""
    row_bytes = pl.cdiv(K, 128) * 128 * 4          # lane-padded row, f32 worst case
    budget = 6 * 1024 * 1024                       # x double-buffer budget (fits v5e 16 MiB scoped)
    cap = min(2048, max(16, (budget // (2 * row_bytes)) // 16 * 16))
    if B <= 16:
        return B                                   # single step; block == full array dims
    half = ((pl.cdiv(B, 2) + 15) // 16) * 16       # >= 2 steps, 16-row aligned (bf16-safe)
    return max(16, min(cap, half))


def transformer_critic_forward(x, slab):
    """x: (B, C, 2), any float dtype. slab: fused params from fuse_critic_params.
    Returns state_value of shape (B,) (PyTorch .squeeze())."""
    B, C, F = x.shape
    K = C * F
    R, H = slab.shape
    assert R >= K + 3, "slab was fused for a different city count"

    x_flat = x.reshape(B, K)                        # free (row-major), lane-dense layout
    TB = _pick_batch_tile(B, K)
    grid = (pl.cdiv(B, TB),)

    out = pl.pallas_call(
        _critic_kernel,
        out_shape=jax.ShapeDtypeStruct((B, 1), jnp.float32),
        grid=grid,
        in_specs=[
            pl.BlockSpec((TB, K), lambda i: (i, 0)),    # x batch tile (native dtype)
            pl.BlockSpec((R, H), lambda i: (0, 0)),     # fused slab, resident across steps
        ],
        out_specs=pl.BlockSpec((TB, 1), lambda i: (i, 0)),
        compiler_params=pltpu.CompilerParams(
            dimension_semantics=("parallel",),
        ),
    )(x_flat, slab)

    return jnp.squeeze(out, axis=-1)                # PyTorch .squeeze() on (B, 1)


def make_params(key, embed=32, hidden=128):
    """Deterministic synthetic parameters with PyTorch nn.Linear-like shapes
    (weights stored as (in, out); biases 1-D, including b2 of shape (1,))."""
    k = jax.random.split(key, 6)
    init = lambda kk, shape, fan_in: (
        jax.random.uniform(kk, shape, jnp.float32, -1.0, 1.0) / jnp.sqrt(float(fan_in))
    )
    return {
        "we": init(k[0], (2, embed), 2),            # nn.Linear(2, embed)
        "be": init(k[1], (embed,), 2),
        "w1": init(k[2], (embed, hidden), embed),   # nn.Linear(embed, 128)
        "b1": init(k[3], (hidden,), embed),
        "w2": init(k[4], (hidden, 1), hidden),      # nn.Linear(128, 1)
        "b2": init(k[5], (1,), hidden),
    }


def _reference(x, p):
    """Pure-JAX reference mirroring the PyTorch forward's returned value
    (embed -> mean over cities -> FF head), no algebraic rewrites."""
    x_embed = jnp.einsum("bcf,fe->bce", x, p["we"]) + p["be"]
    enc_mean = jnp.mean(x_embed, axis=1)
    h = jnp.maximum(enc_mean @ p["w1"] + p["b1"], 0.0)
    v = h @ p["w2"] + p["b2"]
    return jnp.squeeze(v, axis=-1)


if __name__ == "__main__":
    key = jax.random.PRNGKey(0)
    kx1, kx2, kp = jax.random.split(key, 3)

    forward = jax.jit(transformer_critic_forward)

    # Small case matching the module defaults (heads / Nx do not affect the value).
    batch, city, embed = 2, 8, 32
    params = make_params(kp, embed=embed, hidden=128)
    slab = fuse_critic_params(params, city)                 # fused once, outside the call path
    x = jax.random.normal(kx1, (batch, city, 2), dtype=jnp.float32)

    state_value = jax.block_until_ready(forward(x, slab))
    ref = _reference(x, params)
    assert state_value.shape == (batch,)
    assert jnp.allclose(state_value, ref, atol=1e-4, rtol=1e-4), (
        f"mismatch: {state_value} vs {ref}"
    )

    # Larger case: exercises the multi-step parallel grid and partial last block.
    batch2, city2 = 200, 10
    slab2 = fuse_critic_params(params, city2)
    x2 = jax.random.normal(kx2, (batch2, city2, 2), dtype=jnp.float32)

    state_value2 = jax.block_until_ready(forward(x2, slab2))
    ref2 = _reference(x2, params)
    assert state_value2.shape == (batch2,)
    assert jnp.allclose(state_value2, ref2, atol=1e-4, rtol=1e-4), "large-batch mismatch"

    print("KERNEL_OK")
</pallas_src>

<mosaic_0001>
module attributes {stable_mosaic.version = 11 : i64} {
  func.func @_critic_kernel(%arg0: i32, %arg1: memref<2x16xf32, #tpu.memory_space<vmem>>, %arg2: memref<24x128xf32, #tpu.memory_space<vmem>>, %arg3: memref<2x1xf32, #tpu.memory_space<vmem>>) attributes {dimension_semantics = [#tpu.dimension_semantics<parallel>], iteration_bounds = array<i64: 1>, scalar_prefetch = 0 : i64, scratch_operands = 0 : i64, tpu.core_type = #tpu.core_type<tc>, window_params = [{transform_indices = @transform_0, window_bounds = array<i64: 2, 16>}, {pipeline_mode = #tpu.pipeline_mode<synchronous>, transform_indices = @transform_1, window_bounds = array<i64: 24, 128>}, {transform_indices = @transform_2, window_bounds = array<i64: 2, 1>}]} {
    %c0 = arith.constant 0 : index
    %c0_0 = arith.constant 0 : index
    %0 = vector.load %arg1[%c0, %c0_0] : memref<2x16xf32, #tpu.memory_space<vmem>>, vector<2x16xf32>
    %c0_1 = arith.constant 0 : index
    %c0_2 = arith.constant 0 : index
    %1 = vector.load %arg2[%c0_1, %c0_2] : memref<24x128xf32, #tpu.memory_space<vmem>>, vector<16x128xf32>
    %c16 = arith.constant 16 : index
    %c0_3 = arith.constant 0 : index
    %2 = vector.load %arg2[%c16, %c0_3] : memref<24x128xf32, #tpu.memory_space<vmem>>, vector<1x128xf32>
    %c17 = arith.constant 17 : index
    %c0_4 = arith.constant 0 : index
    %3 = vector.load %arg2[%c17, %c0_4] : memref<24x128xf32, #tpu.memory_space<vmem>>, vector<1x128xf32>
    %c18 = arith.constant 18 : index
    %c0_5 = arith.constant 0 : index
    %4 = vector.load %arg2[%c18, %c0_5] : memref<24x128xf32, #tpu.memory_space<vmem>>, vector<1x1xf32>
    %cst = arith.constant dense<0.000000e+00> : vector<2x128xf32>
    %5 = tpu.matmul %0, %1, %cst {dimension_numbers = #tpu.dot_dimension_numbers<[1], [0], [0], [1], [0, 0, 1, 1], [], []>} : vector<2x16xf32>, vector<16x128xf32>, vector<2x128xf32> -> vector<2x128xf32>
    %6 = vector.broadcast %2 : vector<1x128xf32> to vector<2x128xf32>
    %7 = arith.addf %5, %6 : vector<2x128xf32>
    %cst_6 = arith.constant 0.000000e+00 : f32
    %8 = vector.broadcast %cst_6 : f32 to vector<2x128xf32>
    %9 = arith.maximumf %7, %8 : vector<2x128xf32>
    %10 = vector.broadcast %3 : vector<1x128xf32> to vector<2x128xf32>
    %11 = arith.mulf %9, %10 : vector<2x128xf32>
    %cst_7 = arith.constant dense<0.000000e+00> : vector<2xf32>
    %12 = vector.multi_reduction <add>, %11, %cst_7 [1] : vector<2x128xf32> to vector<2xf32>
    %13 = vector.shape_cast %12 : vector<2xf32> to vector<2x1xf32>
    %14 = vector.broadcast %4 : vector<1x1xf32> to vector<2x1xf32>
    %15 = arith.addf %13, %14 : vector<2x1xf32>
    %c0_8 = arith.constant 0 : index
    %c0_9 = arith.constant 0 : index
    %16 = vector.load %arg3[%c0_8, %c0_9] : memref<2x1xf32, #tpu.memory_space<vmem>>, vector<2x1xf32>
    tpu.vector_store %arg3[%c0_8, %c0_9], %15 {strides = array<i32>} : memref<2x1xf32, #tpu.memory_space<vmem>>, vector<2x1xf32>,
    return
  }
  func.func @transform_0(%arg0: i32) -> (i32, i32) {
    %c0_i32 = arith.constant 0 : i32
    %c0_i32_0 = arith.constant 0 : i32
    return %arg0, %c0_i32 : i32, i32
  }
  func.func @transform_1(%arg0: i32) -> (i32, i32) {
    %c0_i32 = arith.constant 0 : i32
    %c0_i32_0 = arith.constant 0 : i32
    %c0_i32_1 = arith.constant 0 : i32
    return %c0_i32, %c0_i32_0 : i32, i32
  }
  func.func @transform_2(%arg0: i32) -> (i32, i32) {
    %c0_i32 = arith.constant 0 : i32
    %c0_i32_0 = arith.constant 0 : i32
    return %arg0, %c0_i32 : i32, i32
  }
}

</mosaic_0001>

<bundles_post_ra>
// kernel: transformer_critic_forward.1
= control target key start
LH: loop header
LB: loop body
LE: loop exit
PB: predicated region body
PF: predicated region fallthrough
CT: control target
= control target key end

     0   :  { %v136_v0 = vmov 0.0|0.0   ;;  %vm137_vm0 = vmmov 0   ;;  %v138_v3 = vmov 0.0   ;;  %vm21_vm1 = vcmask 130048   ;;  %s175_s1 = inlined_call_operand.vmem [shape: f32[24,128], index: 1, kind: input, shape index: {}]   ;;  %s176_s0 = inlined_call_operand.vmem [shape: f32[2,16], index: 0, kind: input, shape index: {}]   ;;  %s177_s2 = inlined_call_operand.vmem [shape: f32[2,1], index: 2, kind: output, shape index: {}]  }
   0x1   :  { %130 = vmatprep.subr.bf16.mxu0 %v136_v0  ;;  %v12_v1 = vld [vmem:[%s175_s1] sm:$0xff]  ;;  %v13_v2 = vld [vmem:[%s175_s1 + $0x8] sm:$0xff]  ;;  %127 = vmatprep.mubr.msk.f32.mxu0 %vm137_vm0, %v138_v3  ;;  %v116_v6 = vld [vmem:[%s175_s1 + $0x10] ss:$0 sm:$0xff]  ;;  %vm101_vm2 = vcmask 1041408   ;;  %vm110_vm3 = vcmask 1024  }
   0x2   :  { %v131_v4 = vpack.c.bf16 %v13_v2, %v12_v1  ;;  %v11_v5 = vld [vmem:[%s176_s0] sm:$0x3]  ;;  %v118_v10 = vld [vmem:[%s175_s1 + $0x11] ss:$0 sm:$0xff]  ;;  %v119_v14 = vld [vmem:[%s175_s1 + $0x12] ss:$0 sm:$0xff] }
   0x4   :  { %132 = vmatpush3.bf16.msra.mxu0 %v131_v4 }
   0x7   :  { %128 = vmatmul.mubr.msk.f32.vlgmr.msra.gmra.mrb[0].mxu0 %vm21_vm1, %v11_v5 }
  0xda   :  { %v91_v7 = vpop.f32.mrb[0].mxu0 }
  0xdb   :  { %v92_v8 = vadd.f32 %v116_v6, %v91_v7  ;;  %v129_v9 = vpop.f32.mrb[1].mxu0 }
  0xdd   :  { %v95_v11 = vmax.f32 %v92_v8, 0.0 }
  0xdf   :  { %v100_v12 = vmul.f32 %v118_v10, %v95_v11 }
  0xe1   :  { %v102_v13 = vsel %vm101_vm2, %v100_v12, 0.0 }
  0xe2   :  { %103 = vadd.xlane.f32.xlu0 %v102_v13 }
 0x16f   :  { %v104_v15 = vpop.xlane.xlu0 %103 }
 0x170   :  { %v109_v16 = vadd.f32 %v119_v14, %v104_v15 }
 0x172   :  { %111 = vst.msk [vmem:[%s177_s2] sm:$0x3] %vm110_vm3, %v109_v16 }

</bundles_post_ra>
